<compile_context>
chip_gen: v6e
topology: v6e:2x2x1
jax: 0.10.0
libtpu: 0.0.40
codegen_flags: <defaults>
</compile_context>

<pallas_src>
import functools

import jax
import jax.numpy as jnp
from jax.experimental import pallas as pl
from jax.experimental.pallas import tpu as pltpu


def _conv_in_lrelu_kernel(x_ref, w_ref, b_ref, g_ref, bt_ref, o_ref, acc_ref,
                          *, K, HW, P, eps, neg_slope):
    """One grid step processes one sample.

    x_ref : (1, K*K*Cin, Dp*HW) bf16  (kh,kw,ci)-folded input; contraction on
            sublanes, flattened (padded-D, H, W) spatial on lanes.
    w_ref : (K, Cout, K*K*Cin) bf16   one dense weight tile per kd tap.
    b_ref : (Cout, 1) f32             conv bias
    g_ref : (Cout, 1) f32             instance-norm gamma
    bt_ref: (Cout, 1) f32             instance-norm beta
    o_ref : (1, Cout, P)              lane-dense output slab (P = D*H*W)
    acc_ref: (Cout, P) f32 VMEM scratch accumulator.
    """
    # Conv3d as K fat matmuls: (Cout, K*K*Cin) @ (K*K*Cin, P) -> (Cout, P).
    # The kd tap is a static lane-offset slice of the flattened padded-D axis.
    for kd in range(K):
        rhs = x_ref[0, :, pl.ds(kd * HW, P)]                    # (K*K*Cin, P) bf16
        tap = jnp.dot(w_ref[kd], rhs, preferred_element_type=jnp.float32)
        if kd == 0:
            acc_ref[...] = tap
        else:
            acc_ref[...] += tap

    # Dropout3d: identity (eval-mode semantics).

    # InstanceNorm3d: per-channel stats over the lane (spatial) axis.
    z = acc_ref[...] + b_ref[...]                               # (Cout, P) f32
    mean = jnp.mean(z, axis=1, keepdims=True)                   # (Cout, 1)
    c = z - mean
    var = jnp.mean(c * c, axis=1, keepdims=True)                # biased variance
    y = c * jax.lax.rsqrt(var + eps)
    y = y * g_ref[...] + bt_ref[...]

    # LeakyReLU
    y = jnp.where(y >= 0, y, neg_slope * y)

    o_ref[...] = y[None].astype(o_ref.dtype)                    # (1, Cout, P)


def conv_dropout_norm_nonlin(x_ncdhw, weight, bias, gamma, beta,
                             *, eps=1e-5, neg_slope=0.01,
                             compute_dtype=jnp.bfloat16):
    """x_ncdhw: (N, Cin, D, H, W). weight: (K, K, K, Cin, Cout). Returns NCDHW."""
    N, Cin, D, H, W = x_ncdhw.shape
    K = weight.shape[0]
    Cout = weight.shape[-1]
    pad = (K - 1) // 2
    HW = H * W
    P = D * HW
    KKC = K * K * Cin
    Dp = D + 2 * pad

    # ---- wrapper-side layout plumbing (pure XLA, no compute hoisted) ----
    # channels-last + "same" padding
    x = jnp.transpose(x_ncdhw, (0, 2, 3, 4, 1))                  # (N, D, H, W, Cin)
    xp = jnp.pad(x, ((0, 0), (pad, pad), (pad, pad), (pad, pad), (0, 0)))

    # Fold the (kh, kw, Cin) taps into one contraction axis (partial im2col).
    cols = [xp[:, :, kh:kh + H, kw:kw + W, :]
            for kh in range(K) for kw in range(K)]               # (N, Dp, H, W, Cin) each
    xcol = jnp.stack(cols, axis=4)                               # (N, Dp, H, W, K*K, Cin)
    xcol = xcol.reshape(N, Dp, HW, KKC)
    # Contraction on sublanes, flattened (d, h, w) spatial on lanes.
    xcolT = jnp.transpose(xcol, (0, 3, 1, 2)).reshape(N, KKC, Dp * HW)
    xcolT = xcolT.astype(compute_dtype)

    # Dense weight tile per kd: (K, Cout, K*K*Cin), bf16.
    wT = jnp.transpose(weight.reshape(K, KKC, Cout), (0, 2, 1)).astype(compute_dtype)

    b2 = bias.reshape(Cout, 1).astype(jnp.float32)
    g2 = gamma.reshape(Cout, 1).astype(jnp.float32)
    bt2 = beta.reshape(Cout, 1).astype(jnp.float32)

    kernel = functools.partial(_conv_in_lrelu_kernel,
                               K=K, HW=HW, P=P, eps=eps, neg_slope=neg_slope)

    out = pl.pallas_call(
        kernel,
        out_shape=jax.ShapeDtypeStruct((N, Cout, P), x_ncdhw.dtype),
        grid_spec=pltpu.PrefetchScalarGridSpec(
            num_scalar_prefetch=0,
            grid=(N,),
            in_specs=[
                pl.BlockSpec((1, KKC, Dp * HW), lambda n: (n, 0, 0)),
                pl.BlockSpec((K, Cout, KKC), lambda n: (0, 0, 0)),
                pl.BlockSpec((Cout, 1), lambda n: (0, 0)),
                pl.BlockSpec((Cout, 1), lambda n: (0, 0)),
                pl.BlockSpec((Cout, 1), lambda n: (0, 0)),
            ],
            out_specs=pl.BlockSpec((1, Cout, P), lambda n: (n, 0, 0)),
            scratch_shapes=[pltpu.VMEM((Cout, P), jnp.float32)],
        ),
        compiler_params=pltpu.CompilerParams(
            dimension_semantics=("parallel",),       # independent samples -> megacore
            vmem_limit_bytes=32 * 1024 * 1024,
        ),
    )(xcolT, wT, b2, g2, bt2)

    # Lane-dense slab (N, Cout, D*H*W) is already NCDHW-ordered; just reshape.
    return out.reshape(N, Cout, D, H, W)


def _reference(x_ncdhw, weight, bias, gamma, beta, *, eps=1e-5, neg_slope=0.01):
    """Pure-JAX f32 reference for correctness checking."""
    w_oidhw = jnp.transpose(weight, (4, 3, 0, 1, 2))             # (Cout,Cin,kd,kh,kw)
    y = jax.lax.conv_general_dilated(
        x_ncdhw, w_oidhw, window_strides=(1, 1, 1),
        padding=((1, 1), (1, 1), (1, 1)),
        dimension_numbers=("NCDHW", "OIDHW", "NCDHW"))
    y = y + bias[None, :, None, None, None]
    mean = jnp.mean(y, axis=(2, 3, 4), keepdims=True)
    var = jnp.mean((y - mean) ** 2, axis=(2, 3, 4), keepdims=True)
    y = (y - mean) / jnp.sqrt(var + eps)
    y = y * gamma[None, :, None, None, None] + beta[None, :, None, None, None]
    return jnp.where(y >= 0, y, neg_slope * y)


if __name__ == "__main__":
    N, Cin, Cout, D, H, W, K = 2, 4, 8, 8, 8, 8, 3

    key = jax.random.PRNGKey(0)
    kx, kw, kb, kg, kbt = jax.random.split(key, 5)
    x = jax.random.normal(kx, (N, Cin, D, H, W), jnp.float32)
    weight = jax.random.normal(kw, (K, K, K, Cin, Cout), jnp.float32) * 0.1
    bias = jax.random.normal(kb, (Cout,), jnp.float32) * 0.1
    gamma = 1.0 + 0.1 * jax.random.normal(kg, (Cout,), jnp.float32)
    beta = 0.1 * jax.random.normal(kbt, (Cout,), jnp.float32)

    out = conv_dropout_norm_nonlin(x, weight, bias, gamma, beta)
    out = jax.block_until_ready(out)

    ref = _reference(x, weight, bias, gamma, beta)
    assert out.shape == (N, Cout, D, H, W), out.shape
    max_err = float(jnp.max(jnp.abs(out - ref)))
    # bf16 matmul operands (f32 accumulation): tolerance loosened per review.
    assert jnp.allclose(out, ref, atol=2e-2, rtol=2e-2), max_err

    print("KERNEL_OK")
</pallas_src>

<mosaic_0001>
module attributes {stable_mosaic.version = 11 : i64} {
  func.func @_conv_in_lrelu_kernel(%arg0: i32, %arg1: memref<1x36x640xbf16, #tpu.memory_space<vmem>>, %arg2: memref<3x8x36xbf16, #tpu.memory_space<vmem>>, %arg3: memref<8x1xf32, #tpu.memory_space<vmem>>, %arg4: memref<8x1xf32, #tpu.memory_space<vmem>>, %arg5: memref<8x1xf32, #tpu.memory_space<vmem>>, %arg6: memref<1x8x512xf32, #tpu.memory_space<vmem>>, %arg7: memref<8x512xf32, #tpu.memory_space<vmem>>) attributes {dimension_semantics = [#tpu.dimension_semantics<parallel>], iteration_bounds = array<i64: 2>, scalar_prefetch = 0 : i64, scratch_operands = 1 : i64, tpu.core_type = #tpu.core_type<tc>, window_params = [{transform_indices = @transform_0, window_bounds = array<i64: 1, 36, 640>}, {pipeline_mode = #tpu.pipeline_mode<synchronous>, transform_indices = @transform_1, window_bounds = array<i64: 3, 8, 36>}, {pipeline_mode = #tpu.pipeline_mode<synchronous>, transform_indices = @transform_2, window_bounds = array<i64: 8, 1>}, {pipeline_mode = #tpu.pipeline_mode<synchronous>, transform_indices = @transform_3, window_bounds = array<i64: 8, 1>}, {pipeline_mode = #tpu.pipeline_mode<synchronous>, transform_indices = @transform_4, window_bounds = array<i64: 8, 1>}, {transform_indices = @transform_5, window_bounds = array<i64: 1, 8, 512>}]} {
    %c0 = arith.constant 0 : index
    %c0_0 = arith.constant 0 : index
    %c0_1 = arith.constant 0 : index
    %0 = vector.load %arg1[%c0, %c0_0, %c0_1] : memref<1x36x640xbf16, #tpu.memory_space<vmem>>, vector<1x36x512xbf16>
    %1 = vector.shape_cast %0 : vector<1x36x512xbf16> to vector<36x512xbf16>
    %c0_2 = arith.constant 0 : index
    %c0_3 = arith.constant 0 : index
    %c0_4 = arith.constant 0 : index
    %2 = vector.load %arg2[%c0_2, %c0_3, %c0_4] : memref<3x8x36xbf16, #tpu.memory_space<vmem>>, vector<1x8x36xbf16>
    %3 = vector.shape_cast %2 : vector<1x8x36xbf16> to vector<8x36xbf16>
    %cst = arith.constant dense<0.000000e+00> : vector<8x512xf32>
    %4 = tpu.matmul %3, %1, %cst {dimension_numbers = #tpu.dot_dimension_numbers<[1], [0], [0], [1], [0, 0, 1, 1], [], []>} : vector<8x36xbf16>, vector<36x512xbf16>, vector<8x512xf32> -> vector<8x512xf32>
    %c0_5 = arith.constant 0 : index
    %c0_6 = arith.constant 0 : index
    %5 = vector.load %arg7[%c0_5, %c0_6] : memref<8x512xf32, #tpu.memory_space<vmem>>, vector<8x512xf32>
    tpu.vector_store %arg7[%c0_5, %c0_6], %4 {strides = array<i32>} : memref<8x512xf32, #tpu.memory_space<vmem>>, vector<8x512xf32>,
    %c0_7 = arith.constant 0 : index
    %c0_8 = arith.constant 0 : index
    %c64 = arith.constant 64 : index
    %6 = vector.load %arg1[%c0_7, %c0_8, %c64] : memref<1x36x640xbf16, #tpu.memory_space<vmem>>, vector<1x36x512xbf16>
    %7 = vector.shape_cast %6 : vector<1x36x512xbf16> to vector<36x512xbf16>
    %c1 = arith.constant 1 : index
    %c0_9 = arith.constant 0 : index
    %c0_10 = arith.constant 0 : index
    %8 = vector.load %arg2[%c1, %c0_9, %c0_10] : memref<3x8x36xbf16, #tpu.memory_space<vmem>>, vector<1x8x36xbf16>
    %9 = vector.shape_cast %8 : vector<1x8x36xbf16> to vector<8x36xbf16>
    %cst_11 = arith.constant dense<0.000000e+00> : vector<8x512xf32>
    %10 = tpu.matmul %9, %7, %cst_11 {dimension_numbers = #tpu.dot_dimension_numbers<[1], [0], [0], [1], [0, 0, 1, 1], [], []>} : vector<8x36xbf16>, vector<36x512xbf16>, vector<8x512xf32> -> vector<8x512xf32>
    %c0_12 = arith.constant 0 : index
    %c0_13 = arith.constant 0 : index
    %11 = vector.load %arg7[%c0_12, %c0_13] : memref<8x512xf32, #tpu.memory_space<vmem>>, vector<8x512xf32>
    %12 = arith.addf %11, %10 : vector<8x512xf32>
    %c0_14 = arith.constant 0 : index
    %c0_15 = arith.constant 0 : index
    %13 = vector.load %arg7[%c0_14, %c0_15] : memref<8x512xf32, #tpu.memory_space<vmem>>, vector<8x512xf32>
    tpu.vector_store %arg7[%c0_14, %c0_15], %12 {strides = array<i32>} : memref<8x512xf32, #tpu.memory_space<vmem>>, vector<8x512xf32>,
    %c0_16 = arith.constant 0 : index
    %c0_17 = arith.constant 0 : index
    %c128 = arith.constant 128 : index
    %14 = vector.load %arg1[%c0_16, %c0_17, %c128] : memref<1x36x640xbf16, #tpu.memory_space<vmem>>, vector<1x36x512xbf16>
    %15 = vector.shape_cast %14 : vector<1x36x512xbf16> to vector<36x512xbf16>
    %c2 = arith.constant 2 : index
    %c0_18 = arith.constant 0 : index
    %c0_19 = arith.constant 0 : index
    %16 = vector.load %arg2[%c2, %c0_18, %c0_19] : memref<3x8x36xbf16, #tpu.memory_space<vmem>>, vector<1x8x36xbf16>
    %17 = vector.shape_cast %16 : vector<1x8x36xbf16> to vector<8x36xbf16>
    %cst_20 = arith.constant dense<0.000000e+00> : vector<8x512xf32>
    %18 = tpu.matmul %17, %15, %cst_20 {dimension_numbers = #tpu.dot_dimension_numbers<[1], [0], [0], [1], [0, 0, 1, 1], [], []>} : vector<8x36xbf16>, vector<36x512xbf16>, vector<8x512xf32> -> vector<8x512xf32>
    %c0_21 = arith.constant 0 : index
    %c0_22 = arith.constant 0 : index
    %19 = vector.load %arg7[%c0_21, %c0_22] : memref<8x512xf32, #tpu.memory_space<vmem>>, vector<8x512xf32>
    %20 = arith.addf %19, %18 : vector<8x512xf32>
    %c0_23 = arith.constant 0 : index
    %c0_24 = arith.constant 0 : index
    %21 = vector.load %arg7[%c0_23, %c0_24] : memref<8x512xf32, #tpu.memory_space<vmem>>, vector<8x512xf32>
    tpu.vector_store %arg7[%c0_23, %c0_24], %20 {strides = array<i32>} : memref<8x512xf32, #tpu.memory_space<vmem>>, vector<8x512xf32>,
    %c0_25 = arith.constant 0 : index
    %c0_26 = arith.constant 0 : index
    %22 = vector.load %arg7[%c0_25, %c0_26] : memref<8x512xf32, #tpu.memory_space<vmem>>, vector<8x512xf32>
    %c0_27 = arith.constant 0 : index
    %c0_28 = arith.constant 0 : index
    %23 = vector.load %arg3[%c0_27, %c0_28] : memref<8x1xf32, #tpu.memory_space<vmem>>, vector<8x1xf32>
    %24 = vector.broadcast %23 : vector<8x1xf32> to vector<8x512xf32>
    %25 = arith.addf %22, %24 : vector<8x512xf32>
    %cst_29 = arith.constant dense<0.000000e+00> : vector<8xf32>
    %26 = vector.multi_reduction <add>, %25, %cst_29 [1] : vector<8x512xf32> to vector<8xf32>
    %27 = vector.shape_cast %26 : vector<8xf32> to vector<8x1xf32>
    %cst_30 = arith.constant 5.120000e+02 : f32
    %28 = vector.broadcast %cst_30 : f32 to vector<8x1xf32>
    %29 = arith.divf %27, %28 : vector<8x1xf32>
    %30 = vector.broadcast %29 : vector<8x1xf32> to vector<8x512xf32>
    %31 = arith.subf %25, %30 : vector<8x512xf32>
    %32 = arith.mulf %31, %31 : vector<8x512xf32>
    %cst_31 = arith.constant dense<0.000000e+00> : vector<8xf32>
    %33 = vector.multi_reduction <add>, %32, %cst_31 [1] : vector<8x512xf32> to vector<8xf32>
    %34 = vector.shape_cast %33 : vector<8xf32> to vector<8x1xf32>
    %cst_32 = arith.constant 5.120000e+02 : f32
    %35 = vector.broadcast %cst_32 : f32 to vector<8x1xf32>
    %36 = arith.divf %34, %35 : vector<8x1xf32>
    %cst_33 = arith.constant 9.99999974E-6 : f32
    %37 = vector.broadcast %cst_33 : f32 to vector<8x1xf32>
    %38 = arith.addf %36, %37 : vector<8x1xf32>
    %39 = math.rsqrt %38 : vector<8x1xf32>
    %40 = vector.broadcast %39 : vector<8x1xf32> to vector<8x512xf32>
    %41 = arith.mulf %31, %40 : vector<8x512xf32>
    %c0_34 = arith.constant 0 : index
    %c0_35 = arith.constant 0 : index
    %42 = vector.load %arg4[%c0_34, %c0_35] : memref<8x1xf32, #tpu.memory_space<vmem>>, vector<8x1xf32>
    %43 = vector.broadcast %42 : vector<8x1xf32> to vector<8x512xf32>
    %44 = arith.mulf %41, %43 : vector<8x512xf32>
    %c0_36 = arith.constant 0 : index
    %c0_37 = arith.constant 0 : index
    %45 = vector.load %arg5[%c0_36, %c0_37] : memref<8x1xf32, #tpu.memory_space<vmem>>, vector<8x1xf32>
    %46 = vector.broadcast %45 : vector<8x1xf32> to vector<8x512xf32>
    %47 = arith.addf %44, %46 : vector<8x512xf32>
    %cst_38 = arith.constant 0.000000e+00 : f32
    %48 = vector.broadcast %cst_38 : f32 to vector<8x512xf32>
    %49 = arith.cmpf oge, %47, %48 : vector<8x512xf32>
    %cst_39 = arith.constant 0.00999999977 : f32
    %50 = vector.broadcast %cst_39 : f32 to vector<8x512xf32>
    %51 = arith.mulf %50, %47 : vector<8x512xf32>
    %52 = arith.select %49, %47, %51 : vector<8x512xi1>, vector<8x512xf32>
    %53 = vector.shape_cast %52 : vector<8x512xf32> to vector<1x8x512xf32>
    %c0_40 = arith.constant 0 : index
    %c0_41 = arith.constant 0 : index
    %c0_42 = arith.constant 0 : index
    %54 = vector.load %arg6[%c0_40, %c0_41, %c0_42] : memref<1x8x512xf32, #tpu.memory_space<vmem>>, vector<1x8x512xf32>
    tpu.vector_store %arg6[%c0_40, %c0_41, %c0_42], %53 {strides = array<i32>} : memref<1x8x512xf32, #tpu.memory_space<vmem>>, vector<1x8x512xf32>,
    return
  }
  func.func @transform_0(%arg0: i32) -> (i32, i32, i32) {
    %c0_i32 = arith.constant 0 : i32
    %c0_i32_0 = arith.constant 0 : i32
    %c0_i32_1 = arith.constant 0 : i32
    return %arg0, %c0_i32, %c0_i32_0 : i32, i32, i32
  }
  func.func @transform_1(%arg0: i32) -> (i32, i32, i32) {
    %c0_i32 = arith.constant 0 : i32
    %c0_i32_0 = arith.constant 0 : i32
    %c0_i32_1 = arith.constant 0 : i32
    %c0_i32_2 = arith.constant 0 : i32
    return %c0_i32, %c0_i32_0, %c0_i32_1 : i32, i32, i32
  }
  func.func @transform_2(%arg0: i32) -> (i32, i32) {
    %c0_i32 = arith.constant 0 : i32
    %c0_i32_0 = arith.constant 0 : i32
    %c0_i32_1 = arith.constant 0 : i32
    return %c0_i32, %c0_i32_0 : i32, i32
  }
  func.func @transform_3(%arg0: i32) -> (i32, i32) {
    %c0_i32 = arith.constant 0 : i32
    %c0_i32_0 = arith.constant 0 : i32
    %c0_i32_1 = arith.constant 0 : i32
    return %c0_i32, %c0_i32_0 : i32, i32
  }
  func.func @transform_4(%arg0: i32) -> (i32, i32) {
    %c0_i32 = arith.constant 0 : i32
    %c0_i32_0 = arith.constant 0 : i32
    %c0_i32_1 = arith.constant 0 : i32
    return %c0_i32, %c0_i32_0 : i32, i32
  }
  func.func @transform_5(%arg0: i32) -> (i32, i32, i32) {
    %c0_i32 = arith.constant 0 : i32
    %c0_i32_0 = arith.constant 0 : i32
    %c0_i32_1 = arith.constant 0 : i32
    return %arg0, %c0_i32, %c0_i32_0 : i32, i32, i32
  }
}

</mosaic_0001>

<bundles_post_ra>
// kernel: tpu_custom_call.1
= control target key start
LH: loop header
LB: loop body
LE: loop exit
PB: predicated region body
PF: predicated region fallthrough
CT: control target
= control target key end

     0   :  { %10 = vsyncpa [#allocation4], 0  ;;  %s1388_s0 = inlined_call_operand.vmem [shape: bf16[2,36,640], index: 0, kind: input, shape index: {}]   ;;  %s1389_s1 = inlined_call_operand.vmem [shape: bf16[3,8,36], index: 1, kind: input, shape index: {}]   ;;  %s1390_s2 = inlined_call_operand.vmem [shape: f32[8,1], index: 2, kind: input, shape index: {}]   ;;  %s1391_s3 = inlined_call_operand.vmem [shape: f32[8,1], index: 3, kind: input, shape index: {}]   ;;  %s1392_s4 = inlined_call_operand.vmem [shape: f32[8,1], index: 4, kind: input, shape index: {}]   ;;  %s1393_s5 = inlined_call_operand.hbm [shape: f32[2,8,512], index: 5, kind: output, shape index: {}]  }
   0x1   :  { %12 = vsyncpa [#allocation4 + $0x1], 0  ;;  %s1187_s18 = smov 0   ;;  %s1189_s19 = smov 0  }
   0x2   :  { %s1191_s20 = smov 0   ;;  %s1193_s21 = smov 0  }
   0x3 LB: > { %s1208_s22 = sadd.s32 4294967295, %s1152_s21   ;;  %s942_s23 = sadd.s32 4294967294, %s1152_s21   ;;  %s1152_s21 = sphi %s1193_s21, %s1399_s21   ;;  %s1148_s20 = sphi %s1191_s20, %s1398_s20   ;;  %s1144_s19 = sphi %s1189_s19, %s1397_s19   ;;  %s1140_s18 = sphi %s1187_s18, %s1396_s18  }
   0x4   : > { %s1212_s24 = sadd.s32 1, %s1152_s21   ;;  %s135_s25 = sadd.s32 1, %s1148_s20 }
   0x5   : > { %s132_s26 = ssub.s32 %s1152_s21, %s1212_s24  ;;  %p145_p0 = scmp.ne.s32.totalorder %s1148_s20, %s1144_s19 }
   0x6   : > { %p133_p1 = scmp.eq.s32.totalorder %s132_s26, 0  ;;  %p146_p2 = scmp.eq.s32.totalorder %s1208_s22, 1 }
   0x7   : > { %p151_p3 = scmp.ne.s32.totalorder %s1144_s19, %s1140_s18  ;;  %p152_p4 = scmp.eq.s32.totalorder %s942_s23, 1 }
   0x8   : > { %s1223_s27 = scalar_select %p133_p1, %s1148_s20, %s135_s25  }
   0x9   : > { %p1225_p5 = por %p146_p2, %p145_p0  ;;  %p1229_p6 = por %p152_p4, %p151_p3 }
   0xa   : > { %p945_p7 = scmp.ge.s32.totalorder %s1152_s21, 1  ;;  %p190_p8 = scmp.lt.s32.totalorder %s1152_s21, 3 }
   0xc   : > { %p191_p9 = pnand %p945_p7, %p190_p8 }
   0xd   : > { %p218_p10 = scmp.lt.s32.totalorder (!%p191_p9), %s1208_s22, 1  ;;  %s1155_s10 = smov (!%p191_p9), 64  }
   0xe   : > { %194 = sbr.rel (%p191_p9) target bundleno = 718 (0x2ce), region = 40  ;;  %s215_s7 = sand.u32 (!%p191_p9), 1, %s1144_s19  }
   0xf   : > { %s946_s8 = sshll.u32 (!%p191_p9), %s215_s7, 5  ;;  %s1156_s16 = smov (!%p191_p9), [#allocation3]  }
  0x10   : > { %s1096_s17 = sshll.u32 (!%p191_p9), %s1156_s16, 4  ;;  %s1097_s17 = int_to_ptr.vmem [resolvable:$false] %s1096_s17 }
  0x11   : > { %s1098_s23 = scalar_lea.vmem (!%p191_p9), %s1097_s17, 1024 }
  0x13   : > { %s219_s30 = scalar_select %p218_p10, %s1208_s22, 1  ;;  %v1154_v0 = vmov 0   ;;  %vm289_vm0 = vcmask 1041408   ;;  %v234_v25 = vld [vmem:[%s1389_s1] sm:$0xf]  ;;  %vm285_vm1 = vcmask 293888  }
  0x14   : > { %334 = vmatprep.mubr.bf16.mxu0 %v1154_v0  ;;  %375 = vmatprep.mubr.bf16.mxu1 %v1154_v0  ;;  %v795_v27 = vld [vmem:[%s1390_s2] sm:$0xff]  ;;  %vm490_vm2 = vcmask 523264  }
  0x15   : > { %1049 = vset.pattern.permute.xlu1 %v1154_v0  ;;  %1050 = vset.pattern.permute.xlu0 %v1154_v0  ;;  %s1007_s6 = smul.u32 100, %s219_s30  ;;  %v964_v57 = vld [vmem:[%s1389_s1 + $0x4] sm:$0xf] }
  0x17   : > { %s1244_s9 = scalar_lea.vmem %s1388_s0, %s1007_s6 }
  0x18   : > { %v401_v1 = vld [vmem:[%s1244_s9 + $0x58] sm:$0x33]  ;;  %v400_v2 = vld [vmem:[%s1244_s9 + $0x50] sm:$0x33]  ;;  %v1055_v6 = vld [vmem:[%s1244_s9 + $0x2c] ss:$20 sps:$4 sm:$0xff]  }
  0x19   : > { %v977_v3 = vcombine.low %v401_v1, %v401_v1  ;;  %v975_v4 = vcombine.low %v400_v2, %v400_v2  ;;  %v976_v5 = vcombine.high %v400_v2, %v400_v2  ;;  %v978_v7 = vcombine.high %v401_v1, %v401_v1  ;;  %v1057_v8 = vld [vmem:[%s1244_s9 + $0x30] ss:$20 sps:$4 sm:$0xff]   ;;  %v1059_v9 = vld [vmem:[%s1244_s9 + $0x60] ss:$0 sps:$4 sm:$0x33]  }
  0x1a   : > { %v1060_v10 = vld [vmem:[%s1244_s9 + $0x28] ss:$20 sps:$4 sm:$0xff]   ;;  %v232_v11 = vld [vmem:[%s1244_s9 + $0x50] sm:$0x33]  ;;  %v1063_v21 = vld [vmem:[%s1244_s9 + $0x4] ss:$20 sps:$4 sm:$0xff]  }
  0x1b   : > { %484 = vrot.lane.b32.xlu1 %v977_v3, %s1155_s10  ;;  %480 = vrot.lane.b32.xlu0 %v975_v4, %s1155_s10  ;;  %v233_v12 = vld [vmem:[%s1244_s9 + $0x58] sm:$0x33]  ;;  %v1066_v13 = vld [vmem:[%s1244_s9 + $0x34] ss:$20 sps:$4 sm:$0xff]   ;;  %v957_v14 = vcombine.high %v232_v11, %v232_v11  ;;  %v956_v15 = vcombine.low %v232_v11, %v232_v11 }
  0x1c   : > { %v959_v16 = vcombine.high %v233_v12, %v233_v12  ;;  %v958_v17 = vcombine.low %v233_v12, %v233_v12  ;;  %v1061_v20 = vld [vmem:[%s1244_s9 + $0x8] ss:$20 sps:$4 sm:$0xff]   ;;  %v1067_v22 = vld [vmem:[%s1244_s9 + $0xc] ss:$20 sps:$4 sm:$0xff]   ;;  %v1069_v26 = vld [vmem:[%s1244_s9 + $0x10] ss:$20 sps:$4 sm:$0xff]  }
  0x1d   : > { %960 = vmatprep.subr.msk.bf16.mxu0 %vm289_vm0, %v957_v14  ;;  %v291_v18 = vsel %vm289_vm0, %v956_v15, 0  ;;  %v1065_v23 = vld [vmem:[%s1244_s9 + $0x38] ss:$20 sps:$4 sm:$0xff]   ;;  %v1068_v24 = vld [vmem:[%s1244_s9] ss:$20 sps:$4 sm:$0xff]  }
  0x1e   : > { %962 = vmatprep.subr.msk.bf16.mxu1 %vm289_vm0, %v959_v16  ;;  %v297_v19 = vsel %vm289_vm0, %v958_v17, 0  ;;  %313 = vmatpush1.bf16.msra.mxu0 %v291_v18  ;;  %v628_v49 = vld [vmem:[%s1244_s9 + $0x54] sm:$0x33]  ;;  %v629_v56 = vld [vmem:[%s1244_s9 + $0x5c] sm:$0x33] }
  0x1f   : > { %482 = vrot.lane.b32.xlu0 %v976_v5, %s1155_s10  ;;  %472 = vrot.lane.b32.xlu1 %v1055_v6, %s1155_s10  ;;  %v994_v52 = vcombine.high %v628_v49, %v628_v49  ;;  %v993_v53 = vcombine.low %v628_v49, %v628_v49  ;;  %v1078_v60 = vld [vmem:[%s1244_s9 + $0x30] ss:$20 sps:$4 sm:$0xff]   ;;  %v996_v62 = vcombine.high %v629_v56, %v629_v56  ;;  %v1076_v3 = vld [vmem:[%s1244_s9 + $0x2c] ss:$20 sps:$4 sm:$0xff]  }
  0x20   : > { %354 = vmatpush1.bf16.msra.mxu1 %v297_v19  ;;  %314 = vmatprep.subr.bf16.mxu0 %v1055_v6  ;;  %v995_v63 = vcombine.low %v629_v56, %v629_v56  ;;  %v1083_v4 = vld [vmem:[%s1244_s9 + $0x8] ss:$20 sps:$4 sm:$0xff]   ;;  %v1086_v6 = vld [vmem:[%s1244_s9 + $0x38] ss:$20 sps:$4 sm:$0xff]  }
  0x21   : > { %355 = vmatprep.subr.bf16.mxu1 %v1066_v13  ;;  %v686_v59 = vsel %vm289_vm0, %v993_v53, 0  ;;  %v1087_v11 = vld [vmem:[%s1244_s9 + $0xc] ss:$20 sps:$4 sm:$0xff]  }
  0x22   : > { %315 = vmatpush1.bf16.msra.mxu0 %v1060_v10  ;;  %v692_v5 = vsel %vm289_vm0, %v995_v63, 0 }
  0x23   : > { %474 = vrot.lane.b32.xlu0 %v1057_v8, %s1155_s10  ;;  %486 = vrot.lane.b32.xlu1 %v978_v7, %s1155_s10  ;;  %v1081_v7 = vld [vmem:[%s1244_s9 + $0x4] ss:$20 sps:$4 sm:$0xff]  }
  0x24   : > { %356 = vmatpush1.bf16.msra.mxu1 %v1057_v8  ;;  %316 = vmatprep.subr.bf16.mxu0 %v1063_v21  ;;  %v1084_v8 = vld [vmem:[%s1244_s9 + $0x34] ss:$20 sps:$4 sm:$0xff]  }
  0x25   : > { %357 = vmatprep.subr.bf16.mxu1 %v1067_v22 }
  0x26   : > { %317 = vmatpush1.bf16.msra.mxu0 %v1068_v24 }
  0x27   : > { %488 = vrot.lane.b32.xlu0 %v1059_v9, %s1155_s10  ;;  %470 = vrot.lane.b32.xlu1 %v1060_v10, %s1155_s10  ;;  %v1089_v9 = vld [vmem:[%s1244_s9 + $0x10] ss:$20 sps:$4 sm:$0xff]   ;;  %v984_v10 = vld [vmem:[%s1389_s1 + $0x8] sm:$0xf]  ;;  %s1006_s9 = sshll.u32 %s1208_s22, 9  ;;  %s869_s22 = scalar_lea.sflag [#allocation4], %s215_s7 }
  0x28   : > { %358 = vmatpush1.bf16.msra.mxu1 %v1061_v20  ;;  %s1345_s14 = scalar_lea.hbm %s1393_s5, %s1006_s9 }
  0x29   : > { %961 = vmatmul.mubr.msk.bf16.vlgmr.msra.gmra.mxu0 %vm285_vm1, %v234_v25 }
  0x2a   : > { %558 = vmatprep.mubr.bf16.mxu0 %v1154_v0 }
  0x2b   : > { %464 = vrot.lane.b32.xlu1 %v1061_v20, %s1155_s10  ;;  %462 = vrot.lane.b32.xlu0 %v1063_v21, %s1155_s10 }
  0x2c   : > { %963 = vmatmul.mubr.msk.bf16.vlgmr.msra.gmra.mxu1 %vm285_vm1, %v234_v25 }
  0x2d   : > { %599 = vmatprep.mubr.bf16.mxu1 %v1154_v0 }
  0x2f   : > { %478 = vrot.lane.b32.xlu1 %v1065_v23, %s1155_s10  ;;  %476 = vrot.lane.b32.xlu0 %v1066_v13, %s1155_s10 }
  0x33   : > { %466 = vrot.lane.b32.xlu1 %v1067_v22, %s1155_s10  ;;  %460 = vrot.lane.b32.xlu0 %v1068_v24, %s1155_s10 }
  0x37   : > { %468 = vrot.lane.b32.xlu0 %v1069_v26, %s1155_s10  ;;  %798 = vperm.xlu1 %1049, %v795_v27   ;;  %s217_s10 = scalar_lea.vmem [#allocation3], %s946_s8 }
  0x38   : > { %s883_s11 = sshll.u32 %s217_s10, 4  ;;  %s1347_s11 = int_to_ptr.vmem [resolvable:$true] %s883_s11 }
  0x39   : > { %s1092_s15 = scalar_lea.vmem %s1347_s11, 512  ;;  %p1099_p0 = scmp.lt.s32.totalorder %s1347_s11, %s1097_s17 }
  0x3a   : > { %p1093_p11 = scmp.ne.s32.totalorder %s1347_s11, %s1092_s15  ;;  %p1100_p1 = scmp.lt.s32.totalorder %s1098_s23, %s1092_s15 }
  0x3c   : > { %p1094_p12 = pnand %p1093_p11, %p1225_p5  ;;  %p1101_p2 = por %p1100_p1, %p1099_p0 }
  0x3e   : > { %p1095_p13 = pneg %p1094_p12 }
  0x40   : > { %p1102_p3 = pnand %p1101_p2, %p1095_p13 }
  0x8d   : > { %v485_v28 = vpop.permute.xlu1 %484  ;;  %v481_v29 = vpop.permute.xlu0 %480 }
  0x91   : > { %v483_v30 = vpop.permute.xlu0 %482  ;;  %v473_v31 = vpop.permute.xlu1 %472 }
  0x92   : > { %v499_v32 = vsel %vm490_vm2, %v481_v29, %v483_v30  ;;  %v500_v33 = vsel %vm490_vm2, %v483_v30, %v485_v28 }
  0x93   : > { %v515_v34 = vsel %vm289_vm0, %v499_v32, 0  ;;  %980 = vmatprep.subr.msk.bf16.mxu0 %vm289_vm0, %v500_v33 }
  0x94   : > { %537 = vmatpush1.bf16.msra.mxu0 %v515_v34 }
  0x95   : > { %v475_v35 = vpop.permute.xlu0 %474  ;;  %v487_v36 = vpop.permute.xlu1 %486 }
  0x96   : > { %v496_v37 = vsel %vm490_vm2, %v473_v31, %v475_v35  ;;  %v501_v38 = vsel %vm490_vm2, %v485_v28, %v487_v36 }
  0x97   : > { %538 = vmatprep.subr.bf16.mxu0 %v496_v37  ;;  %v521_v43 = vsel %vm289_vm0, %v501_v38, 0 }
  0x99   : > { %v489_v39 = vpop.permute.xlu0 %488  ;;  %v471_v40 = vpop.permute.xlu1 %470 }
  0x9a   : > { %v502_v41 = vsel %vm490_vm2, %v487_v36, %v489_v39  ;;  %v495_v42 = vsel %vm490_vm2, %v471_v40, %v473_v31 }
  0x9b   : > { %539 = vmatpush1.bf16.msra.mxu0 %v495_v42  ;;  %982 = vmatprep.subr.msk.bf16.mxu1 %vm289_vm0, %v502_v41 }
  0x9c   : > { %578 = vmatpush1.bf16.msra.mxu1 %v521_v43 }
  0x9d   : > { %v465_v44 = vpop.permute.xlu1 %464  ;;  %v463_v45 = vpop.permute.xlu0 %462 }
  0x9e   : > { %v492_v46 = vsel %vm490_vm2, %v463_v45, %v465_v44 }
  0x9f   : > { %540 = vmatprep.subr.bf16.mxu0 %v492_v46 }
  0xa1   : > { %v479_v47 = vpop.permute.xlu1 %478  ;;  %v477_v48 = vpop.permute.xlu0 %476 }
  0xa2   : > { %v497_v50 = vsel %vm490_vm2, %v475_v35, %v477_v48  ;;  %v498_v51 = vsel %vm490_vm2, %v477_v48, %v479_v47 }
  0xa3   : > { %579 = vmatprep.subr.bf16.mxu1 %v498_v51  ;;  %v832_v51 = vld [vmem:[%s1391_s3] sm:$0xff] }
  0xa4   : > { %580 = vmatpush1.bf16.msra.mxu1 %v497_v50 }
  0xa5   : > { %v461_v54 = vpop.permute.xlu0 %460  ;;  %v467_v58 = vpop.permute.xlu1 %466 }
  0xa6   : > { %v491_v55 = vsel %vm490_vm2, %v461_v54, %v463_v45  ;;  %v493_v2 = vsel %vm490_vm2, %v465_v44, %v467_v58 }
  0xa7   : > { %541 = vmatpush1.bf16.msra.mxu0 %v491_v55 }
  0xa8   : > { %997 = vmatprep.subr.msk.bf16.mxu0 %vm289_vm0, %v994_v52 }
  0xa9   : > { %v469_v61 = vpop.permute.xlu0 %468 }
  0xaa   : > { %981 = vmatmul.mubr.msk.bf16.vlgmr.msra.gmra.mxu0 %vm285_vm1, %v964_v57  ;;  %v494_v1 = vsel %vm490_vm2, %v467_v58, %v469_v61 }
  0xab   : > { %581 = vmatprep.subr.bf16.mxu1 %v494_v1  ;;  %708 = vmatpush1.bf16.msra.mxu0 %v686_v59 }
  0xac   : > { %582 = vmatpush1.bf16.msra.mxu1 %v493_v2  ;;  %709 = vmatprep.subr.bf16.mxu0 %v1078_v60  ;;  %v842_v2 = vld [vmem:[%s1392_s4] sm:$0xff] }
  0xad   : > { %999 = vmatprep.subr.msk.bf16.mxu1 %vm289_vm0, %v996_v62  ;;  %729 = vmatprep.mubr.bf16.mxu0 %v1154_v0 }
  0xaf   : > { %983 = vmatmul.mubr.msk.bf16.vlgmr.msra.gmra.mxu1 %vm285_vm1, %v964_v57  ;;  %710 = vmatpush1.bf16.msra.mxu0 %v1076_v3 }
  0xb0   : > { %749 = vmatpush1.bf16.msra.mxu1 %v692_v5  ;;  %711 = vmatprep.subr.bf16.mxu0 %v1083_v4 }
  0xb1   : > { %750 = vmatprep.subr.bf16.mxu1 %v1086_v6  ;;  %770 = vmatprep.mubr.bf16.mxu1 %v1154_v0 }
  0xb2   : > { %v799_v31 = vpop.permute.xlu1 %798 }
  0xb3   : > { %712 = vmatpush1.bf16.msra.mxu0 %v1081_v7 }
  0xb4   : > { %751 = vmatpush1.bf16.msra.mxu1 %v1084_v8 }
  0xb5   : > { %752 = vmatprep.subr.bf16.mxu1 %v1089_v9 }
  0xb6   : > { %998 = vmatmul.mubr.msk.bf16.vlgmr.msra.gmra.mxu0 %vm285_vm1, %v984_v10 }
  0xb8   : > { %753 = vmatpush1.bf16.msra.mxu1 %v1087_v11 }
  0xbb   : > { %1000 = vmatmul.mubr.msk.bf16.vlgmr.msra.gmra.mxu1 %vm285_vm1, %v984_v10 }
  0xe9   : > { %v336_v12 = vpop.f32.mrf.mxu0 }
  0xeb   : > { %v338_v14 = vpop.f32.mrf.mxu0 }
  0xec   : > { %v377_v13 = vpop.f32.mrf.mxu1 }
  0xed   : > { %v340_v16 = vpop.f32.mrf.mxu0 }
  0xee   : > { %v379_v15 = vpop.f32.mrf.mxu1 }
  0xef   : > { %v341_v0 = vpop.f32.mrf.mxu0 }
  0xf0   : > { %v381_v17 = vpop.f32.mrf.mxu1 }
  0xf2   : > { %v382_v18 = vpop.f32.mrf.mxu1 }
 0x16a   : > { %v560_v19 = vpop.f32.mrf.mxu0 }
 0x16b   : > { %v612_v26 = vadd.f32 %v560_v19, %v336_v12 }
 0x16c   : > { %v562_v20 = vpop.f32.mrf.mxu0 }
 0x16d   : > { %v613_v29 = vadd.f32 %v562_v20, %v338_v14 }
 0x16e   : > { %v564_v21 = vpop.f32.mrf.mxu0 }
 0x16f   : > { %v601_v22 = vpop.f32.mrf.mxu1 }
 0x170   : > { %v565_v23 = vpop.f32.mrf.mxu0  ;;  %v614_v34 = vadd.f32 %v601_v22, %v377_v13 }
 0x171   : > { %v603_v24 = vpop.f32.mrf.mxu1 }
 0x172   : > { %v615_v39 = vadd.f32 %v603_v24, %v379_v15 }
 0x173   : > { %v605_v25 = vpop.f32.mrf.mxu1 }
 0x175   : > { %v606_v27 = vpop.f32.mrf.mxu1 }
 0x176   : > { %v731_v28 = vpop.f32.mrf.mxu0 }
 0x177   : > { %v783_v30 = vadd.f32 %v731_v28, %v612_v26 }
 0x178   : > { %v733_v32 = vpop.f32.mrf.mxu0 }
 0x179   : > { %v784_v33 = vadd.f32 %v733_v32, %v613_v29  ;;  %v801_v36 = vadd.f32 %v799_v31, %v783_v30 }
 0x17a   : > { %v735_v35 = vpop.f32.mrf.mxu0 }
 0x17b   : > { %v802_v37 = vadd.f32 %v799_v31, %v784_v33  ;;  %v772_v38 = vpop.f32.mrf.mxu1 }
 0x17c   : > { %v785_v40 = vadd.f32 %v772_v38, %v614_v34  ;;  %v736_v41 = vpop.f32.mrf.mxu0 }
 0x17d   : > { %v805_v42 = vadd.f32 %v802_v37, %v801_v36  ;;  %v774_v43 = vpop.f32.mrf.mxu1 }
 0x17e   : > { %v803_v44 = vadd.f32 %v799_v31, %v785_v40  ;;  %v786_v45 = vadd.f32 %v774_v43, %v615_v39 }
 0x17f   : > { %v776_v46 = vpop.f32.mrf.mxu1 }
 0x180   : > { %v804_v47 = vadd.f32 %v799_v31, %v786_v45  ;;  %v806_v48 = vadd.f32 %v805_v42, %v803_v44 }
 0x181   : > { %v777_v49 = vpop.f32.mrf.mxu1 }
 0x182   : > { %v807_v50 = vadd.f32 %v806_v48, %v804_v47 }
 0x184   : > { %808 = vadd.xlane.f32.xlu0 %v807_v50 }
 0x19a   : > { %835 = vperm.xlu0 %1050, %v832_v51  }
 0x20d   : > { %v809_v52 = vpop.xlane.xlu0 %808 }
 0x20e   : > { %v811_v53 = vmul.f32 0.001953125, %v809_v52 }
 0x210   : > { %v812_v54 = vsub.f32 %v801_v36, %v811_v53  ;;  %v813_v55 = vsub.f32 %v802_v37, %v811_v53  ;;  %v814_v56 = vsub.f32 %v803_v44, %v811_v53  ;;  %v815_v57 = vsub.f32 %v804_v47, %v811_v53 }
 0x212   : > { %v816_v58 = vmul.f32 %v812_v54, %v812_v54  ;;  %v817_v59 = vmul.f32 %v813_v55, %v813_v55  ;;  %v818_v60 = vmul.f32 %v814_v56, %v814_v56  ;;  %v819_v62 = vmul.f32 %v815_v57, %v815_v57 }
 0x214   : > { %v820_v61 = vadd.f32 %v817_v59, %v816_v58 }
 0x215   : > { %v836_v7 = vpop.permute.xlu0 %835 }
 0x216   : > { %v821_v63 = vadd.f32 %v820_v61, %v818_v60 }
 0x218   : > { %v822_v1 = vadd.f32 %v821_v63, %v819_v62 }
 0x21a   : > { %823 = vadd.xlane.f32.xlu1 %v822_v1 }
 0x22b   : > { %845 = vperm.xlu1 %1049, %v842_v2  }
 0x2a3   : > { %v824_v3 = vpop.xlane.xlu1 %823 }
 0x2a4   : > { %v825_v4 = vmul.f32 0.001953125, %v824_v3 }
 0x2a6   : > { %v826_v5 = vadd.f32 1e-05, %v825_v4 }
 0x2a7   : > { %v846_v16 = vpop.permute.xlu1 %845 }
 0x2a8   : > { %1090 = vrsqrt.f32 %v826_v5 }
 0x2b5   : > { %v1091_v6 = vpop.eup %1090 }
 0x2b6   : > { %v828_v8 = vmul.f32 %v1091_v6, %v812_v54  ;;  %v829_v9 = vmul.f32 %v1091_v6, %v813_v55  ;;  %v830_v10 = vmul.f32 %v1091_v6, %v814_v56  ;;  %v831_v11 = vmul.f32 %v1091_v6, %v815_v57 }
 0x2b8   : > { %v838_v12 = vmul.f32 %v836_v7, %v828_v8  ;;  %v839_v13 = vmul.f32 %v836_v7, %v829_v9  ;;  %v840_v14 = vmul.f32 %v836_v7, %v830_v10  ;;  %v841_v15 = vmul.f32 %v836_v7, %v831_v11 }
 0x2ba   : > { %v848_v17 = vadd.f32 %v846_v16, %v838_v12  ;;  %v849_v0 = vadd.f32 %v846_v16, %v839_v13  ;;  %v850_v18 = vadd.f32 %v846_v16, %v840_v14  ;;  %v851_v19 = vadd.f32 %v846_v16, %v841_v15 }
 0x2bc   : > { %vm852_vm3 = vcmp.ge.f32.partialorder %v848_v17, 0.0  ;;  %vm853_vm4 = vcmp.ge.f32.partialorder %v849_v0, 0.0  ;;  %vm854_vm5 = vcmp.ge.f32.partialorder %v850_v18, 0.0  ;;  %vm855_vm6 = vcmp.ge.f32.partialorder %v851_v19, 0.0 }
 0x2bd   : > { %v856_v20 = vmul.f32 0.01, %v848_v17  ;;  %v857_v21 = vmul.f32 0.01, %v849_v0  ;;  %v858_v22 = vmul.f32 0.01, %v850_v18 }
 0x2be   : > { %v859_v23 = vmul.f32 0.01, %v851_v19 }
 0x2bf   : > { %v860_v24 = vsel %vm852_vm3, %v848_v17, %v856_v20  ;;  %v861_v25 = vsel %vm853_vm4, %v849_v0, %v857_v21  ;;  %v862_v26 = vsel %vm854_vm5, %v850_v18, %v858_v22 }
 0x2c0   : > { %v863_v27 = vsel %vm855_vm6, %v851_v19, %v859_v23  ;;  %864 = vst [vmem:[%s217_s10] sm:$0xff] %v860_v24  ;;  %865 = vst [vmem:[%s217_s10 + $0x8] sm:$0xff] %v861_v25 }
 0x2c1   : > { %866 = vst [vmem:[%s217_s10 + $0x10] sm:$0xff] %v862_v26  ;;  %867 = vst [vmem:[%s217_s10 + $0x18] sm:$0xff] %v863_v27 }
 0x2c2   : > { %1105 = shalt.err (!%p1102_p3)
}
 0x2c3   : > { %s1106_s25 = scalar_lea.hbm %s1345_s14, 512  ;;  %s1110_s6 = scalar_lea.hbm %s1393_s5, 1024 }
 0x2c4   : > { %p1107_p4 = scmp.ne.s32.totalorder %s1345_s14, %s1106_s25  ;;  %p1111_p9 = scmp.lt.s32.totalorder %s1345_s14, %s1393_s5 }
 0x2c5   : > { %p1112_p10 = scmp.lt.s32.totalorder %s1110_s6, %s1106_s25 }
 0x2c6   : > { %p1108_p7 = pnand %p1107_p4, %p1225_p5 }
 0x2c7   : > { %p1113_p11 = por %p1112_p10, %p1111_p9 }
 0x2c8   : > { %p1109_p8 = pneg %p1108_p7 }
 0x2ca   : > { %p1114_p12 = pnand %p1113_p11, %p1109_p8 }
 0x2cc   : > { %1117 = shalt.err (!%p1114_p12)
}
 0x2cd   : > { %1008 = dma.vmem_to_hbm [thread:$0]  (%p1225_p5), %s1347_s11, 512, %s1345_s14, %s869_s22  }
 0x2ce PF: > { %p1014_p13 = scmp.ge.s32.totalorder %s1152_s21, 2  ;;  %s895_s9 = sand.u32 1, %s1140_s18  }
 0x2cf   : > { %s896_s10 = scalar_lea.sflag [#allocation4], %s895_s9 }
 0x2d0   : > { %p1011_p0 = pnand %p1014_p13, %p1229_p6 }
 0x2d2   : > { %p1012_p1 = pneg %p1011_p0 }
 0x2d4   : > { %1135 = dma.done.wait (%p1012_p1), %s896_s10, 512  }
 0x2d5   : > { %1137 = vsyncadd (%p1012_p1), %s896_s10, 4294966784  ;;  %p15_p2 = scmp.ge.s32.totalorder %s1212_s24, 4   ;;  %s1396_s18 = smov %s1144_s19 }
 0x2d6   : > { %s1397_s19 = smov %s1148_s20  ;;  %s1398_s20 = smov %s1223_s27 }
 0x2d7   : > { %s1399_s21 = smov %s1212_s24  ;;  %17 = sbr.rel (!%p15_p2) target bundleno = 3 (0x3), region = 77 }
 0x2dc   :  { %901 = vsyncpa [#allocation4], 1 }
 0x2dd   :  { %903 = vsyncpa [#allocation4 + $0x1], 1 }

</bundles_post_ra>
